<compile_context>
chip_gen: v7x
topology: tpu7x:2x2x1
jax: 0.10.0
libtpu: 0.0.40
codegen_flags: <defaults>
</compile_context>

<pallas_src>
import math

import jax
import jax.numpy as jnp
import numpy as np
from jax.experimental import pallas as pl
from jax.experimental.pallas import tpu as pltpu


def _swiglu_kernel(x_ref, w1_ref, w3_ref, w2_ref, o_ref, acc_ref):
    """One (row-tile i, hidden-tile j) grid step of the fused SwiGLU.

    x_ref  : [tm, D]  bf16 activations (same block for every hidden step)
    w1_ref : [D, th]  bf16 block of w1^T
    w3_ref : [D, th]  bf16 block of w3^T
    w2_ref : [th, D]  bf16 block of w2^T
    o_ref  : [tm, D]  output tile (revisited across the hidden axis)
    acc_ref: [tm, D]  f32 VMEM accumulator
    """
    j = pl.program_id(1)

    @pl.when(j == 0)
    def _():
        acc_ref[...] = jnp.zeros_like(acc_ref)

    x = x_ref[...]
    # bf16 MXU matmuls, f32 accumulation.
    h1 = jnp.dot(x, w1_ref[...], preferred_element_type=jnp.float32)
    h3 = jnp.dot(x, w3_ref[...], preferred_element_type=jnp.float32)

    # silu(h1) * h3 in f32; the reciprocal goes to the EUP slot (approx vrcp).
    sig = pl.reciprocal(1.0 + jnp.exp(-h1), approx=True)
    g = (h1 * sig) * h3

    # Down-projection: accumulate partial products over the hidden axis.
    acc_ref[...] += jnp.dot(g.astype(w2_ref.dtype), w2_ref[...],
                            preferred_element_type=jnp.float32)

    @pl.when(j == pl.num_programs(1) - 1)
    def _():
        o_ref[...] = acc_ref[...].astype(o_ref.dtype)


def _pick_tile(extent, preferred, align):
    """Largest multiple of `align` that divides `extent` and is <= preferred,
    else the full extent (full-extent blocks always satisfy the (8,128) rule)."""
    if extent % preferred == 0:
        return preferred
    t = (min(preferred, extent) // align) * align
    while t >= align:
        if extent % t == 0:
            return t
        t -= align
    return extent


def swiglu_forward(x, w1t, w3t, w2t, *, block_m=256, block_h=512):
    """Fused SwiGLU: w2(silu(w1 x) * w3 x).  Dropout is identity (eval mode).

    x   : [..., D]
    w1t : [D, H]  (= torch w1.weight.T, pre-transposed once at param load)
    w3t : [D, H]  (= torch w3.weight.T)
    w2t : [H, D]  (= torch w2.weight.T)
    """
    orig_shape = x.shape
    D = orig_shape[-1]
    H = w1t.shape[1]
    M = math.prod(orig_shape[:-1])
    x2 = x.reshape(M, D)

    tm = _pick_tile(M, block_m, 8)      # sublane-aligned row tile
    th = _pick_tile(H, block_h, 128)    # lane-aligned hidden tile
    grid = (M // tm, H // th)

    out = pl.pallas_call(
        _swiglu_kernel,
        out_shape=jax.ShapeDtypeStruct((M, D), x.dtype),
        grid_spec=pltpu.PrefetchScalarGridSpec(
            num_scalar_prefetch=0,
            grid=grid,
            in_specs=[
                pl.BlockSpec((tm, D), lambda i, j: (i, 0)),   # x rows
                pl.BlockSpec((D, th), lambda i, j: (0, j)),   # w1^T block
                pl.BlockSpec((D, th), lambda i, j: (0, j)),   # w3^T block
                pl.BlockSpec((th, D), lambda i, j: (j, 0)),   # w2^T block
            ],
            out_specs=pl.BlockSpec((tm, D), lambda i, j: (i, 0)),
            scratch_shapes=[pltpu.VMEM((tm, D), jnp.float32)],
        ),
        compiler_params=pltpu.CompilerParams(
            dimension_semantics=("parallel", "arbitrary")),
    )(x2, w1t, w3t, w2t)
    return out.reshape(orig_shape)


def make_params(key, dim, hidden):
    """Weights in the pre-transposed [in, out] layout the kernel wants."""
    k1, k2, k3 = jax.random.split(key, 3)

    def init(k, fan_in, shape):
        return (jax.random.normal(k, shape, jnp.float32)
                / math.sqrt(fan_in)).astype(jnp.bfloat16)

    return {
        "w1t": init(k1, dim, (dim, hidden)),     # torch w1.weight.T
        "w3t": init(k3, dim, (dim, hidden)),     # torch w3.weight.T
        "w2t": init(k2, hidden, (hidden, dim)),  # torch w2.weight.T
    }


if __name__ == "__main__":
    # Module defaults: dim=32 -> hidden = multiple_of * ceil((2*4*dim/3)/4) = 88
    dim = 32
    multiple_of = 4
    hidden = int(2 * (4 * dim) / 3)
    hidden = multiple_of * ((hidden + multiple_of - 1) // multiple_of)
    B, S = 2, 8

    key = jax.random.PRNGKey(0)
    kx, kp = jax.random.split(key)
    params = make_params(kp, dim, hidden)
    x = jax.random.normal(kx, (B, S, dim), jnp.float32).astype(jnp.bfloat16)

    out = swiglu_forward(x, params["w1t"], params["w3t"], params["w2t"])
    out = jax.block_until_ready(out)
    assert out.shape == (B, S, dim)

    # f32 reference (dropout is identity in eval mode).
    # TODO(synk): nn.Dropout training path not implemented (identity; no RNG in kernel).
    xf = x.astype(jnp.float32).reshape(B * S, dim)
    h1 = xf @ params["w1t"].astype(jnp.float32)
    h3 = xf @ params["w3t"].astype(jnp.float32)
    ref = ((h1 * jax.nn.sigmoid(h1)) * h3) @ params["w2t"].astype(jnp.float32)
    ref = ref.reshape(B, S, dim)

    err = float(jnp.max(jnp.abs(out.astype(jnp.float32) - ref)))
    assert np.isfinite(err) and err < 1e-1, f"max abs err {err}"
    print("KERNEL_OK")
</pallas_src>

<mosaic_0001>
module attributes {stable_mosaic.version = 11 : i64} {
  func.func @_swiglu_kernel(%arg0: i32, %arg1: i32, %arg2: memref<16x32xbf16, #tpu.memory_space<vmem>>, %arg3: memref<32x88xbf16, #tpu.memory_space<vmem>>, %arg4: memref<32x88xbf16, #tpu.memory_space<vmem>>, %arg5: memref<88x32xbf16, #tpu.memory_space<vmem>>, %arg6: memref<16x32xbf16, #tpu.memory_space<vmem>>, %arg7: memref<16x32xf32, #tpu.memory_space<vmem>>) attributes {dimension_semantics = [#tpu.dimension_semantics<parallel>, #tpu.dimension_semantics<arbitrary>], iteration_bounds = array<i64: 1, 1>, scalar_prefetch = 0 : i64, scratch_operands = 1 : i64, tpu.core_type = #tpu.core_type<tc>, window_params = [{transform_indices = @transform_0, window_bounds = array<i64: 16, 32>}, {transform_indices = @transform_1, window_bounds = array<i64: 32, 88>}, {transform_indices = @transform_2, window_bounds = array<i64: 32, 88>}, {transform_indices = @transform_3, window_bounds = array<i64: 88, 32>}, {transform_indices = @transform_4, window_bounds = array<i64: 16, 32>}]} {
    %c0_i32 = arith.constant 0 : i32
    %0 = arith.cmpi eq, %arg1, %c0_i32 : i32
    %1 = arith.extui %0 : i1 to i32
    %c0_i32_0 = arith.constant 0 : i32
    %2 = arith.cmpi ne, %1, %c0_i32_0 : i32
    scf.if %2 {
      %cst_18 = arith.constant 0.000000e+00 : f32
      %25 = vector.broadcast %cst_18 : f32 to vector<16x32xf32>
      %c0_19 = arith.constant 0 : index
      %c0_20 = arith.constant 0 : index
      %26 = vector.load %arg7[%c0_19, %c0_20] : memref<16x32xf32, #tpu.memory_space<vmem>>, vector<16x32xf32>
      tpu.vector_store %arg7[%c0_19, %c0_20], %25 {strides = array<i32>} : memref<16x32xf32, #tpu.memory_space<vmem>>, vector<16x32xf32>,
    } else {
    }
    %c0 = arith.constant 0 : index
    %c0_1 = arith.constant 0 : index
    %3 = vector.load %arg2[%c0, %c0_1] : memref<16x32xbf16, #tpu.memory_space<vmem>>, vector<16x32xbf16>
    %c0_2 = arith.constant 0 : index
    %c0_3 = arith.constant 0 : index
    %4 = vector.load %arg3[%c0_2, %c0_3] : memref<32x88xbf16, #tpu.memory_space<vmem>>, vector<32x88xbf16>
    %cst = arith.constant dense<0.000000e+00> : vector<16x88xf32>
    %5 = tpu.matmul %3, %4, %cst {dimension_numbers = #tpu.dot_dimension_numbers<[1], [0], [0], [1], [0, 0, 1, 1], [], []>} : vector<16x32xbf16>, vector<32x88xbf16>, vector<16x88xf32> -> vector<16x88xf32>
    %c0_4 = arith.constant 0 : index
    %c0_5 = arith.constant 0 : index
    %6 = vector.load %arg4[%c0_4, %c0_5] : memref<32x88xbf16, #tpu.memory_space<vmem>>, vector<32x88xbf16>
    %cst_6 = arith.constant dense<0.000000e+00> : vector<16x88xf32>
    %7 = tpu.matmul %3, %6, %cst_6 {dimension_numbers = #tpu.dot_dimension_numbers<[1], [0], [0], [1], [0, 0, 1, 1], [], []>} : vector<16x32xbf16>, vector<32x88xbf16>, vector<16x88xf32> -> vector<16x88xf32>
    %cst_7 = arith.constant 0.000000e+00 : f32
    %8 = vector.broadcast %cst_7 : f32 to vector<16x88xf32>
    %9 = arith.subf %8, %5 : vector<16x88xf32>
    %10 = math.exp %9 : vector<16x88xf32>
    %cst_8 = arith.constant 1.000000e+00 : f32
    %11 = vector.broadcast %cst_8 : f32 to vector<16x88xf32>
    %12 = arith.addf %11, %10 : vector<16x88xf32>
    %13 = tpu.reciprocal %12 {approx = true} : vector<16x88xf32> -> vector<16x88xf32>
    %14 = arith.mulf %5, %13 : vector<16x88xf32>
    %15 = arith.mulf %14, %7 : vector<16x88xf32>
    %c0_9 = arith.constant 0 : index
    %c0_10 = arith.constant 0 : index
    %16 = vector.load %arg7[%c0_9, %c0_10] : memref<16x32xf32, #tpu.memory_space<vmem>>, vector<16x32xf32>
    %17 = arith.truncf %15 : vector<16x88xf32> to vector<16x88xbf16>
    %c0_11 = arith.constant 0 : index
    %c0_12 = arith.constant 0 : index
    %18 = vector.load %arg5[%c0_11, %c0_12] : memref<88x32xbf16, #tpu.memory_space<vmem>>, vector<88x32xbf16>
    %cst_13 = arith.constant dense<0.000000e+00> : vector<16x32xf32>
    %19 = tpu.matmul %17, %18, %cst_13 {dimension_numbers = #tpu.dot_dimension_numbers<[1], [0], [0], [1], [0, 0, 1, 1], [], []>} : vector<16x88xbf16>, vector<88x32xbf16>, vector<16x32xf32> -> vector<16x32xf32>
    %20 = arith.addf %16, %19 : vector<16x32xf32>
    %c0_14 = arith.constant 0 : index
    %c0_15 = arith.constant 0 : index
    %21 = vector.load %arg7[%c0_14, %c0_15] : memref<16x32xf32, #tpu.memory_space<vmem>>, vector<16x32xf32>
    tpu.vector_store %arg7[%c0_14, %c0_15], %20 {strides = array<i32>} : memref<16x32xf32, #tpu.memory_space<vmem>>, vector<16x32xf32>,
    %c0_i32_16 = arith.constant 0 : i32
    %22 = arith.cmpi eq, %arg1, %c0_i32_16 : i32
    %23 = arith.extui %22 : i1 to i32
    %c0_i32_17 = arith.constant 0 : i32
    %24 = arith.cmpi ne, %23, %c0_i32_17 : i32
    scf.if %24 {
      %c0_18 = arith.constant 0 : index
      %c0_19 = arith.constant 0 : index
      %25 = vector.load %arg7[%c0_18, %c0_19] : memref<16x32xf32, #tpu.memory_space<vmem>>, vector<16x32xf32>
      %26 = arith.truncf %25 : vector<16x32xf32> to vector<16x32xbf16>
      %c0_20 = arith.constant 0 : index
      %c0_21 = arith.constant 0 : index
      %27 = vector.load %arg6[%c0_20, %c0_21] : memref<16x32xbf16, #tpu.memory_space<vmem>>, vector<16x32xbf16>
      tpu.vector_store %arg6[%c0_20, %c0_21], %26 {strides = array<i32>} : memref<16x32xbf16, #tpu.memory_space<vmem>>, vector<16x32xbf16>,
    } else {
    }
    return
  }
  func.func @transform_0(%arg0: i32, %arg1: i32) -> (i32, i32) {
    %c0_i32 = arith.constant 0 : i32
    %c0_i32_0 = arith.constant 0 : i32
    return %arg0, %c0_i32 : i32, i32
  }
  func.func @transform_1(%arg0: i32, %arg1: i32) -> (i32, i32) {
    %c0_i32 = arith.constant 0 : i32
    %c0_i32_0 = arith.constant 0 : i32
    return %c0_i32, %arg1 : i32, i32
  }
  func.func @transform_2(%arg0: i32, %arg1: i32) -> (i32, i32) {
    %c0_i32 = arith.constant 0 : i32
    %c0_i32_0 = arith.constant 0 : i32
    return %c0_i32, %arg1 : i32, i32
  }
  func.func @transform_3(%arg0: i32, %arg1: i32) -> (i32, i32) {
    %c0_i32 = arith.constant 0 : i32
    %c0_i32_0 = arith.constant 0 : i32
    return %arg1, %c0_i32 : i32, i32
  }
  func.func @transform_4(%arg0: i32, %arg1: i32) -> (i32, i32) {
    %c0_i32 = arith.constant 0 : i32
    %c0_i32_0 = arith.constant 0 : i32
    return %arg0, %c0_i32 : i32, i32
  }
}

</mosaic_0001>

<bundles_post_ra>
// kernel: tpu_custom_call.1
= control target key start
LH: loop header
LB: loop body
LE: loop exit
PB: predicated region body
PF: predicated region fallthrough
CT: control target
= control target key end

     0   :  { %v408_v1 = vmov 0.0   ;;  %vm409_vm0 = vmmov 0   ;;  %vm23_vm1 = vcmask 261120   ;;  %s489_s0 = inlined_call_operand.vmem [shape: bf16[16,32], index: 0, kind: input, shape index: {}]   ;;  %s490_s1 = inlined_call_operand.vmem [shape: bf16[32,88], index: 1, kind: input, shape index: {}]   ;;  %s491_s2 = inlined_call_operand.vmem [shape: bf16[32,88], index: 2, kind: input, shape index: {}]   ;;  %s492_s3 = inlined_call_operand.vmem [shape: bf16[88,32], index: 3, kind: input, shape index: {}]   ;;  %s493_s4 = inlined_call_operand.hbm [shape: bf16[16,32], index: 4, kind: output, shape index: {}]  }
   0x1   :  { %v365_v0 = vld [vmem:[%s490_s1] sm:$0xff]   ;;  %328 = vmatprep.subr.bf16.mxu1 %v408_v1  ;;  %344 = vmatprep.subr.bf16.mxu0 %v408_v1  ;;  %v366_v2 = vld [vmem:[%s490_s1 + $0x8] sm:$0xff]   ;;  %24 = vst.msk [vmem:[#allocation2] sm:$0xff] %vm23_vm1, %v408_v1  ;;  %25 = vst.msk [vmem:[#allocation2 + $0x8] sm:$0xff] %vm23_vm1, %v408_v1 }
   0x2   :  { %329 = vmatpush3.bf16.msra.mxu1 %v365_v0  ;;  %332 = vmatprep.mubr.msk.bf16.mxu1 %vm409_vm0, %v408_v1  ;;  %v367_v3 = vld [vmem:[%s489_s0] sm:$0xff]  }
   0x3   :  { %330 = vmatprep.subr.bf16.mxu1 %v408_v1  ;;  %356 = vmatprep.mubr.msk.bf16.mxu0 %vm409_vm0, %v408_v1  ;;  %v368_v4 = vld [vmem:[%s491_s2] sm:$0xff]  }
   0x6   :  { %331 = vmatpush3.bf16.msra.mxu1 %v366_v2 }
   0x7   :  { %336 = vmatprep.subr.bf16.mxu1 %v408_v1 }
   0x8   :  { %9 = vsyncpa [#allocation4], 0  ;;  %v369_v5 = vld [vmem:[%s491_s2 + $0x8] sm:$0xff]   ;;  %v370_v6 = vld [vmem:[%s492_s3] sm:$0xff]   ;;  %vm216_vm2 = vcmask 1043456   ;;  %vm212_vm3 = vcmask 719872  }
   0x9   :  { %333 = vmatmul.mubr.msk.bf16.vlgmr.msra.gmra.mrb[0].mxu1 %vm23_vm1, %v367_v3  ;;  %345 = vmatpush3.bf16.msra.mxu0 %v370_v6  ;;  %v371_v7 = vld [vmem:[%s492_s3 + $0x8] sm:$0xff]   ;;  %v372_v8 = vld [vmem:[%s492_s3 + $0x10] sm:$0xff]   ;;  %v373_v9 = vld [vmem:[%s492_s3 + $0x18] sm:$0xff]   ;;  %vm278_vm4 = vcmask 257024  }
   0xa   :  { %337 = vmatpush3.bf16.msra.mxu1 %v368_v4  ;;  %340 = vmatprep.mubr.msk.bf16.mxu1 %vm409_vm0, %v408_v1  ;;  %v374_v10 = vld [vmem:[%s492_s3 + $0x20] sm:$0xff]   ;;  %v375_v11 = vld [vmem:[%s492_s3 + $0x28] ss:$0 sps:$4 sm:$0xff]   ;;  %s410_s3 = smov [#allocation3]  }
   0xb   :  { %338 = vmatprep.subr.bf16.mxu1 %v408_v1  ;;  %346 = vmatprep.subr.bf16.mxu0 %v408_v1  ;;  %v218_v12 = vsel %vm216_vm2, %v375_v11, 0  ;;  %v165_v36 = vld [vmem:[#allocation2] sm:$0xff]  ;;  %v166_v38 = vld [vmem:[#allocation2 + $0x8] sm:$0xff]  ;;  %s286_s8 = sshll.u32 %s410_s3, 4  ;;  %s287_s8 = int_to_ptr.vmem [resolvable:$true] %s286_s8 }
   0xc   :  { %s384_s9 = scalar_lea.vmem %s287_s8, 128  ;;  %p389_p1 = scmp.lt.s32.totalorder %s287_s8, %s287_s8 }
   0xd   :  { %347 = vmatpush3.bf16.msra.mxu0 %v371_v7  ;;  %p385_p0 = scmp.ne.s32.totalorder %s287_s8, %s384_s9  ;;  %p390_p2 = scmp.lt.s32.totalorder %s384_s9, %s384_s9 }
   0xe   :  { %339 = vmatpush3.bf16.msra.mxu1 %v369_v5  ;;  %348 = vmatprep.subr.bf16.mxu0 %v408_v1 }
   0xf   :  { %p391_p3 = por %p390_p2, %p389_p1 }
  0x11   :  { %341 = vmatmul.mubr.msk.bf16.vlgmr.msra.gmra.mrb[4].mxu1 %vm23_vm1, %v367_v3  ;;  %349 = vmatpush3.bf16.msra.mxu0 %v372_v8  ;;  %p392_p4 = pnand %p391_p3, %p385_p0 }
  0x12   :  { %350 = vmatprep.subr.bf16.mxu0 %v408_v1 }
  0x15   :  { %351 = vmatpush3.bf16.msra.mxu0 %v373_v9 }
  0x16   :  { %352 = vmatprep.subr.bf16.mxu0 %v408_v1 }
  0x19   :  { %353 = vmatpush3.bf16.msra.mxu0 %v374_v10 }
  0x1a   :  { %354 = vmatprep.subr.bf16.mxu0 %v408_v1 }
  0x1d   :  { %355 = vmatpush3.bf16.msra.mxu0 %v218_v12 }
  0xdc   :  { %v87_v13 = vpop.f32.mrb[0].mxu1 }
  0xdd   :  { %v151_v14 = vsub.f32 0.0, %v87_v13  ;;  %v334_v15 = vpop.f32.mrb[1].mxu1 }
  0xde   :  { %v90_v16 = vpop.f32.mrb[2].mxu1 }
  0xdf   :  { %v153_v17 = vmul.f32 1.442695, %v151_v14  ;;  %v152_v18 = vsub.f32 0.0, %v90_v16  ;;  %v335_v19 = vpop.f32.mrb[3].mxu1 }
  0xe1   :  { %376 = vpow2.f32 %v153_v17  ;;  %v155_v20 = vmul.f32 1.442695, %v152_v18 }
  0xe3   :  { %378 = vpow2.f32 %v155_v20 }
  0xe4   :  { %v144_v21 = vpop.f32.mrb[4].mxu1 }
  0xe5   :  { %v342_v22 = vpop.f32.mrb[5].mxu1 }
  0xe6   :  { %v147_v23 = vpop.f32.mrb[6].mxu1 }
  0xe7   :  { %v343_v24 = vpop.f32.mrb[7].mxu1 }
  0xeb   :  { %v377_v25 = vpop.eup %376 }
  0xec   :  { %v157_v26 = vadd.f32 1.0, %v377_v25 }
  0xed   :  { %v379_v27 = vpop.eup %378 }
  0xee   :  { %380 = vrcp.f32 %v157_v26  ;;  %v158_v28 = vadd.f32 1.0, %v379_v27 }
  0xf0   :  { %382 = vrcp.f32 %v158_v28 }
  0xf8   :  { %v381_v29 = vpop.eup %380 }
  0xf9   :  { %v161_v30 = vmul.f32 %v381_v29, %v87_v13 }
  0xfa   :  { %v383_v31 = vpop.eup %382 }
  0xfb   :  { %v162_v32 = vmul.f32 %v383_v31, %v90_v16  ;;  %v163_v33 = vmul.f32 %v161_v30, %v144_v21 }
  0xfd   :  { %v164_v34 = vmul.f32 %v162_v32, %v147_v23 }
  0xff   :  { %v167_v35 = vpack.c.bf16 %v164_v34, %v163_v33 }
 0x101   :  { %357 = vmatmul.mubr.msk.bf16.vlgmr.msra.gmra.mrb[0].mxu0 %vm212_vm3, %v167_v35 }
 0x1d4   :  { %v254_v37 = vpop.f32.mrb[0].mxu0 }
 0x1d5   :  { %v261_v39 = vadd.f32 %v254_v37, %v165_v36  ;;  %v358_v40 = vpop.f32.mrb[1].mxu0 }
 0x1d6   :  { %v257_v41 = vpop.f32.mrb[2].mxu0 }
 0x1d7   :  { %263 = vst.msk [vmem:[#allocation2] sm:$0xff] %vm23_vm1, %v261_v39  ;;  %v262_v42 = vadd.f32 %v257_v41, %v166_v38  ;;  %v359_v43 = vpop.f32.mrb[3].mxu0 }
 0x1d9   :  { %264 = vst.msk [vmem:[#allocation2 + $0x8] sm:$0xff] %vm23_vm1, %v262_v42 }
 0x1de   :  { %v268_v44 = vld [vmem:[#allocation2] sm:$0xff] }
 0x1df   :  { %v313_v45 = vpack.c.bf16 %v268_v44, %v268_v44 }
 0x1e0   :  { %v269_v46 = vld [vmem:[#allocation2 + $0x8] sm:$0xff] }
 0x1e1   :  { %v314_v47 = vpack.c.bf16 %v269_v46, %v269_v46  ;;  %279 = vst.msk [vmem:[#allocation3] sm:$0xf] %vm278_vm4, %v313_v45 }
 0x1e3   :  { %280 = vst.msk [vmem:[#allocation3 + $0x4] sm:$0xf] %vm278_vm4, %v314_v47 }
 0x1e4   :  { %395 = shalt.err (!%p392_p4)
}
 0x1e5   :  { %s396_s12 = scalar_lea.hbm %s493_s4, 128 }
 0x1e6   :  { %p397_p5 = scmp.ne.s32.totalorder %s493_s4, %s396_s12  ;;  %p400_p6 = scmp.lt.u32.totalorder %s396_s12, %s493_s4 }
 0x1e8   :  { %p402_p7 = pnand %p400_p6, %p397_p5 }
 0x1ea   :  { %405 = shalt.err (!%p402_p7)
}
 0x1eb   :  { %s411_s17 = smov 64   ;;  %s412_s18 = smov 4  }
 0x1ec   :  { %292 = dma.vmem_to_hbm [thread:$0]  %s287_s8, 128, %s493_s4, [#allocation4], %s411_s17, %s411_s17, %s412_s18  }
 0x1ed   :  { %406 = dma.done.wait [#allocation4], 128  }
 0x1ee   :  { %407 = vsyncadd [#allocation4], 4294967168 }
 0x1ef   :  { %296 = vsyncpa [#allocation4], 1 }

</bundles_post_ra>
